<compile_context>
chip_gen: v7x
topology: tpu7x:2x2x1
jax: 0.10.0
libtpu: 0.0.40
codegen_flags: <defaults>
</compile_context>

<pallas_src>
import functools

import jax
import jax.numpy as jnp
from jax.experimental import pallas as pl
from jax.experimental.pallas import tpu as pltpu


def _layernorm_kernel(x_ref, alpha_ref, bias_ref, o_ref, *, eps, d_model, fold):
    """Row-wise LayerNorm on a (tile_rows, fold * d_model) block.

    Each packed row holds `fold` independent logical rows of width d_model
    (fold == 1 for the plain path).  alpha/bias arrive already tiled `fold`
    times along the lane axis.
    """
    x = x_ref[...].astype(jnp.float32)          # (tm, fold*D)
    alpha = alpha_ref[...].astype(jnp.float32)  # (1,  fold*D)
    bias = bias_ref[...].astype(jnp.float32)    # (1,  fold*D)

    inv_n = 1.0 / float(d_model)
    # torch.Tensor.std default: unbiased (ddof=1). Guard d_model==1 against a
    # trace-time ZeroDivisionError (torch would return NaN there anyway).
    inv_ddof = 1.0 / float(max(d_model - 1, 1))

    cols = []
    for j in range(fold):                       # static unroll, fold is small
        seg = x[:, j * d_model:(j + 1) * d_model]            # (tm, D)
        mean = jnp.sum(seg, axis=-1, keepdims=True) * inv_n  # (tm, 1)
        diff = seg - mean
        var = jnp.sum(diff * diff, axis=-1, keepdims=True) * inv_ddof
        # Per-row reciprocal ((tm,1)) instead of a per-element divide.
        # approx=False keeps ~1-ulp parity with the torch reference.
        inv = pl.reciprocal(jnp.sqrt(var) + eps, approx=False)
        # Recompute (seg - mean) here instead of reusing `diff` so the
        # reduction-pass temporary is not kept live across the output pass.
        cols.append((seg - mean) * inv)

    y = cols[0] if fold == 1 else jnp.concatenate(cols, axis=-1)
    o_ref[...] = (alpha * y + bias).astype(o_ref.dtype)


def _row_alignment(dtype):
    itemsize = jnp.dtype(dtype).itemsize
    if itemsize == 1:
        return 32
    if itemsize == 2:
        return 16
    return 8


def _vmem_capacity_bytes():
    """Per-TensorCore VMEM capacity; conservative fallback if query fails."""
    try:
        return int(pltpu.get_tpu_info().vmem_capacity_bytes)
    except Exception:
        return 64 * 1024 * 1024   # assume the smallest (v7x) when unknown


def _pick_tile_rows(n_rows, d_pack, dtype, requested, vmem_cap):
    align = _row_alignment(dtype)
    if n_rows <= align:
        # A block equal to the full array is always legal.
        return n_rows

    auto = requested is None
    if auto:
        itemsize = jnp.dtype(dtype).itemsize
        # Live VMEM per row: double-buffered in + out pipeline blocks
        # (2 + 2 tiles at storage dtype) plus ~3 f32 compute intermediates.
        bytes_per_row = d_pack * (4 * itemsize + 3 * 4)
        # Generation-aware budget: <= cap/4 and never more than 24 MiB.
        budget = min(24 * 1024 * 1024, vmem_cap // 4)
        requested = max(align, min(512, budget // max(bytes_per_row, 1)))

    tile = max(align, (min(int(requested), n_rows) // align) * align)

    if auto:
        # Ensure >=2 (target 4) grid steps so v7x's two TensorCores share the
        # work; never shrink a large problem's tile below 256 rows (per-step
        # overhead) and always keep sublane alignment.
        min_tile = align if n_rows < 512 else 256
        while pl.cdiv(n_rows, tile) < 4 and tile // 2 >= min_tile:
            tile = max(min_tile, ((tile // 2) // align) * align)
    return tile


def layer_norm(x, alpha, bias, *, eps=1e-6, tile_rows=None):
    """x: (..., d_model); alpha, bias: (d_model,)."""
    orig_shape = x.shape
    d_model = orig_shape[-1]
    x2 = x.reshape(-1, d_model)
    n_rows = x2.shape[0]

    # Lane-dense packing for small d_model: fold several whole rows into the
    # 128-lane vreg width.  The reshape is row-major contiguous -> free, and
    # HBM traffic is unchanged; only the in-kernel layout gets lane-dense.
    fold = 1
    if d_model < 128 and 128 % d_model == 0:
        f = 128 // d_model
        if n_rows % f == 0:
            fold = f
    d_pack = fold * d_model
    n_pack = n_rows // fold
    x_pack = x2.reshape(n_pack, d_pack)

    alpha2 = jnp.tile(alpha.reshape(1, d_model), (1, fold))
    bias2 = jnp.tile(bias.reshape(1, d_model), (1, fold))

    vmem_cap = _vmem_capacity_bytes()
    tr = _pick_tile_rows(n_pack, d_pack, x_pack.dtype, tile_rows, vmem_cap)
    grid = (pl.cdiv(n_pack, tr),)

    # <=40 MiB on v7x (64 MiB physical), <=48 MiB on v5e/v6e (128 MiB).
    vmem_limit = int(min(48 * 1024 * 1024, (vmem_cap * 5) // 8))

    kernel = functools.partial(
        _layernorm_kernel, eps=eps, d_model=d_model, fold=fold)

    out = pl.pallas_call(
        kernel,
        out_shape=jax.ShapeDtypeStruct((n_pack, d_pack), x.dtype),
        grid_spec=pltpu.PrefetchScalarGridSpec(
            num_scalar_prefetch=0,
            grid=grid,
            in_specs=[
                pl.BlockSpec((tr, d_pack), lambda i: (i, 0)),
                pl.BlockSpec((1, d_pack), lambda i: (0, 0)),
                pl.BlockSpec((1, d_pack), lambda i: (0, 0)),
            ],
            out_specs=pl.BlockSpec((tr, d_pack), lambda i: (i, 0)),
        ),
        compiler_params=pltpu.CompilerParams(
            dimension_semantics=("parallel",),
            vmem_limit_bytes=vmem_limit,
        ),
    )(x_pack, alpha2, bias2)

    return out.reshape(orig_shape)


def layer_norm_ref(x, alpha, bias, eps=1e-6):
    """Pure-JAX reference matching the torch module exactly."""
    xf = x.astype(jnp.float32)
    mean = jnp.mean(xf, axis=-1, keepdims=True)
    var = jnp.sum((xf - mean) ** 2, axis=-1, keepdims=True) / max(x.shape[-1] - 1, 1)
    std = jnp.sqrt(var)
    return (alpha * (xf - mean) / (std + eps) + bias).astype(x.dtype)


if __name__ == "__main__":
    key = jax.random.PRNGKey(0)
    k0, k1, k2 = jax.random.split(key, 3)

    checks = []

    # Shape implied by the module context: batch=2, seq=8, d_model=32.
    # Exercises the folded lane-dense path (4 rows packed per 128-lane row).
    x_a = jax.random.normal(k0, (2, 8, 32), dtype=jnp.float32)
    checks.append((x_a, jnp.ones((32,), jnp.float32), jnp.zeros((32,), jnp.float32)))

    # d_model a multiple of 128: plain lane-dense path, several grid steps.
    x_b = jax.random.normal(k1, (4, 16, 128), dtype=jnp.float32)
    checks.append((x_b, jnp.ones((128,), jnp.float32), jnp.zeros((128,), jnp.float32)))

    # d_model neither a multiple nor a divisor of 128: fallback path with a
    # ragged last row block (masked writeback) and non-trivial alpha/bias.
    x_c = jax.random.normal(k2, (3, 5, 96), dtype=jnp.float32)
    alpha_c = 0.5 + 0.01 * jnp.arange(96, dtype=jnp.float32)
    bias_c = 0.1 * jnp.ones((96,), jnp.float32)
    checks.append((x_c, alpha_c, bias_c))

    for xv, av, bv in checks:
        out = jax.block_until_ready(layer_norm(xv, av, bv, eps=1e-6))
        ref = layer_norm_ref(xv, av, bv, eps=1e-6)
        assert out.shape == xv.shape
        assert jnp.allclose(out, ref, atol=1e-5, rtol=1e-5), "mismatch vs reference"

    print("KERNEL_OK")
</pallas_src>

<mosaic_0001>
module attributes {stable_mosaic.version = 11 : i64} {
  func.func @_layernorm_kernel(%arg0: i32, %arg1: memref<4x128xf32, #tpu.memory_space<vmem>>, %arg2: memref<1x128xf32, #tpu.memory_space<vmem>>, %arg3: memref<1x128xf32, #tpu.memory_space<vmem>>, %arg4: memref<4x128xf32, #tpu.memory_space<vmem>>) attributes {dimension_semantics = [#tpu.dimension_semantics<parallel>], iteration_bounds = array<i64: 1>, scalar_prefetch = 0 : i64, scratch_operands = 0 : i64, tpu.core_type = #tpu.core_type<tc>, window_params = [{transform_indices = @transform_0, window_bounds = array<i64: 4, 128>}, {pipeline_mode = #tpu.pipeline_mode<synchronous>, transform_indices = @transform_1, window_bounds = array<i64: 1, 128>}, {pipeline_mode = #tpu.pipeline_mode<synchronous>, transform_indices = @transform_2, window_bounds = array<i64: 1, 128>}, {transform_indices = @transform_3, window_bounds = array<i64: 4, 128>}]} {
    %c0 = arith.constant 0 : index
    %c0_0 = arith.constant 0 : index
    %0 = vector.load %arg1[%c0, %c0_0] : memref<4x128xf32, #tpu.memory_space<vmem>>, vector<4x128xf32>
    %c0_1 = arith.constant 0 : index
    %c0_2 = arith.constant 0 : index
    %1 = vector.load %arg2[%c0_1, %c0_2] : memref<1x128xf32, #tpu.memory_space<vmem>>, vector<1x128xf32>
    %c0_3 = arith.constant 0 : index
    %c0_4 = arith.constant 0 : index
    %2 = vector.load %arg3[%c0_3, %c0_4] : memref<1x128xf32, #tpu.memory_space<vmem>>, vector<1x128xf32>
    %3 = vector.extract_strided_slice %0 {offsets = [0, 0], sizes = [4, 32], strides = [1, 1]} : vector<4x128xf32> to vector<4x32xf32>
    %cst = arith.constant dense<0.000000e+00> : vector<4xf32>
    %4 = vector.multi_reduction <add>, %3, %cst [1] : vector<4x32xf32> to vector<4xf32>
    %5 = vector.shape_cast %4 : vector<4xf32> to vector<4x1xf32>
    %cst_5 = arith.constant 3.125000e-02 : f32
    %6 = vector.broadcast %cst_5 : f32 to vector<4x1xf32>
    %7 = arith.mulf %5, %6 : vector<4x1xf32>
    %8 = vector.broadcast %7 : vector<4x1xf32> to vector<4x32xf32>
    %9 = arith.subf %3, %8 : vector<4x32xf32>
    %10 = arith.mulf %9, %9 : vector<4x32xf32>
    %cst_6 = arith.constant dense<0.000000e+00> : vector<4xf32>
    %11 = vector.multi_reduction <add>, %10, %cst_6 [1] : vector<4x32xf32> to vector<4xf32>
    %12 = vector.shape_cast %11 : vector<4xf32> to vector<4x1xf32>
    %cst_7 = arith.constant 0.0322580636 : f32
    %13 = vector.broadcast %cst_7 : f32 to vector<4x1xf32>
    %14 = arith.mulf %12, %13 : vector<4x1xf32>
    %15 = math.sqrt %14 : vector<4x1xf32>
    %cst_8 = arith.constant 9.99999997E-7 : f32
    %16 = vector.broadcast %cst_8 : f32 to vector<4x1xf32>
    %17 = arith.addf %15, %16 : vector<4x1xf32>
    %18 = tpu.reciprocal %17 : vector<4x1xf32> -> vector<4x1xf32>
    %19 = vector.broadcast %7 : vector<4x1xf32> to vector<4x32xf32>
    %20 = arith.subf %3, %19 : vector<4x32xf32>
    %21 = vector.broadcast %18 : vector<4x1xf32> to vector<4x32xf32>
    %22 = arith.mulf %20, %21 : vector<4x32xf32>
    %23 = vector.extract_strided_slice %0 {offsets = [0, 32], sizes = [4, 32], strides = [1, 1]} : vector<4x128xf32> to vector<4x32xf32>
    %cst_9 = arith.constant dense<0.000000e+00> : vector<4xf32>
    %24 = vector.multi_reduction <add>, %23, %cst_9 [1] : vector<4x32xf32> to vector<4xf32>
    %25 = vector.shape_cast %24 : vector<4xf32> to vector<4x1xf32>
    %cst_10 = arith.constant 3.125000e-02 : f32
    %26 = vector.broadcast %cst_10 : f32 to vector<4x1xf32>
    %27 = arith.mulf %25, %26 : vector<4x1xf32>
    %28 = vector.broadcast %27 : vector<4x1xf32> to vector<4x32xf32>
    %29 = arith.subf %23, %28 : vector<4x32xf32>
    %30 = arith.mulf %29, %29 : vector<4x32xf32>
    %cst_11 = arith.constant dense<0.000000e+00> : vector<4xf32>
    %31 = vector.multi_reduction <add>, %30, %cst_11 [1] : vector<4x32xf32> to vector<4xf32>
    %32 = vector.shape_cast %31 : vector<4xf32> to vector<4x1xf32>
    %cst_12 = arith.constant 0.0322580636 : f32
    %33 = vector.broadcast %cst_12 : f32 to vector<4x1xf32>
    %34 = arith.mulf %32, %33 : vector<4x1xf32>
    %35 = math.sqrt %34 : vector<4x1xf32>
    %cst_13 = arith.constant 9.99999997E-7 : f32
    %36 = vector.broadcast %cst_13 : f32 to vector<4x1xf32>
    %37 = arith.addf %35, %36 : vector<4x1xf32>
    %38 = tpu.reciprocal %37 : vector<4x1xf32> -> vector<4x1xf32>
    %39 = vector.broadcast %27 : vector<4x1xf32> to vector<4x32xf32>
    %40 = arith.subf %23, %39 : vector<4x32xf32>
    %41 = vector.broadcast %38 : vector<4x1xf32> to vector<4x32xf32>
    %42 = arith.mulf %40, %41 : vector<4x32xf32>
    %43 = vector.extract_strided_slice %0 {offsets = [0, 64], sizes = [4, 32], strides = [1, 1]} : vector<4x128xf32> to vector<4x32xf32>
    %cst_14 = arith.constant dense<0.000000e+00> : vector<4xf32>
    %44 = vector.multi_reduction <add>, %43, %cst_14 [1] : vector<4x32xf32> to vector<4xf32>
    %45 = vector.shape_cast %44 : vector<4xf32> to vector<4x1xf32>
    %cst_15 = arith.constant 3.125000e-02 : f32
    %46 = vector.broadcast %cst_15 : f32 to vector<4x1xf32>
    %47 = arith.mulf %45, %46 : vector<4x1xf32>
    %48 = vector.broadcast %47 : vector<4x1xf32> to vector<4x32xf32>
    %49 = arith.subf %43, %48 : vector<4x32xf32>
    %50 = arith.mulf %49, %49 : vector<4x32xf32>
    %cst_16 = arith.constant dense<0.000000e+00> : vector<4xf32>
    %51 = vector.multi_reduction <add>, %50, %cst_16 [1] : vector<4x32xf32> to vector<4xf32>
    %52 = vector.shape_cast %51 : vector<4xf32> to vector<4x1xf32>
    %cst_17 = arith.constant 0.0322580636 : f32
    %53 = vector.broadcast %cst_17 : f32 to vector<4x1xf32>
    %54 = arith.mulf %52, %53 : vector<4x1xf32>
    %55 = math.sqrt %54 : vector<4x1xf32>
    %cst_18 = arith.constant 9.99999997E-7 : f32
    %56 = vector.broadcast %cst_18 : f32 to vector<4x1xf32>
    %57 = arith.addf %55, %56 : vector<4x1xf32>
    %58 = tpu.reciprocal %57 : vector<4x1xf32> -> vector<4x1xf32>
    %59 = vector.broadcast %47 : vector<4x1xf32> to vector<4x32xf32>
    %60 = arith.subf %43, %59 : vector<4x32xf32>
    %61 = vector.broadcast %58 : vector<4x1xf32> to vector<4x32xf32>
    %62 = arith.mulf %60, %61 : vector<4x32xf32>
    %63 = vector.extract_strided_slice %0 {offsets = [0, 96], sizes = [4, 32], strides = [1, 1]} : vector<4x128xf32> to vector<4x32xf32>
    %cst_19 = arith.constant dense<0.000000e+00> : vector<4xf32>
    %64 = vector.multi_reduction <add>, %63, %cst_19 [1] : vector<4x32xf32> to vector<4xf32>
    %65 = vector.shape_cast %64 : vector<4xf32> to vector<4x1xf32>
    %cst_20 = arith.constant 3.125000e-02 : f32
    %66 = vector.broadcast %cst_20 : f32 to vector<4x1xf32>
    %67 = arith.mulf %65, %66 : vector<4x1xf32>
    %68 = vector.broadcast %67 : vector<4x1xf32> to vector<4x32xf32>
    %69 = arith.subf %63, %68 : vector<4x32xf32>
    %70 = arith.mulf %69, %69 : vector<4x32xf32>
    %cst_21 = arith.constant dense<0.000000e+00> : vector<4xf32>
    %71 = vector.multi_reduction <add>, %70, %cst_21 [1] : vector<4x32xf32> to vector<4xf32>
    %72 = vector.shape_cast %71 : vector<4xf32> to vector<4x1xf32>
    %cst_22 = arith.constant 0.0322580636 : f32
    %73 = vector.broadcast %cst_22 : f32 to vector<4x1xf32>
    %74 = arith.mulf %72, %73 : vector<4x1xf32>
    %75 = math.sqrt %74 : vector<4x1xf32>
    %cst_23 = arith.constant 9.99999997E-7 : f32
    %76 = vector.broadcast %cst_23 : f32 to vector<4x1xf32>
    %77 = arith.addf %75, %76 : vector<4x1xf32>
    %78 = tpu.reciprocal %77 : vector<4x1xf32> -> vector<4x1xf32>
    %79 = vector.broadcast %67 : vector<4x1xf32> to vector<4x32xf32>
    %80 = arith.subf %63, %79 : vector<4x32xf32>
    %81 = vector.broadcast %78 : vector<4x1xf32> to vector<4x32xf32>
    %82 = arith.mulf %80, %81 : vector<4x32xf32>
    %83 = tpu.concatenate %22, %42, %62, %82 in 1 : vector<4x32xf32>, vector<4x32xf32>, vector<4x32xf32>, vector<4x32xf32> -> vector<4x128xf32>
    %84 = vector.broadcast %1 : vector<1x128xf32> to vector<4x128xf32>
    %85 = arith.mulf %84, %83 : vector<4x128xf32>
    %86 = vector.broadcast %2 : vector<1x128xf32> to vector<4x128xf32>
    %87 = arith.addf %85, %86 : vector<4x128xf32>
    %c0_24 = arith.constant 0 : index
    %c0_25 = arith.constant 0 : index
    %88 = vector.load %arg4[%c0_24, %c0_25] : memref<4x128xf32, #tpu.memory_space<vmem>>, vector<4x128xf32>
    tpu.vector_store %arg4[%c0_24, %c0_25], %87 {strides = array<i32>} : memref<4x128xf32, #tpu.memory_space<vmem>>, vector<4x128xf32>,
    return
  }
  func.func @transform_0(%arg0: i32) -> (i32, i32) {
    %c0_i32 = arith.constant 0 : i32
    %c0_i32_0 = arith.constant 0 : i32
    return %arg0, %c0_i32 : i32, i32
  }
  func.func @transform_1(%arg0: i32) -> (i32, i32) {
    %c0_i32 = arith.constant 0 : i32
    %c0_i32_0 = arith.constant 0 : i32
    %c0_i32_1 = arith.constant 0 : i32
    return %c0_i32, %c0_i32_0 : i32, i32
  }
  func.func @transform_2(%arg0: i32) -> (i32, i32) {
    %c0_i32 = arith.constant 0 : i32
    %c0_i32_0 = arith.constant 0 : i32
    %c0_i32_1 = arith.constant 0 : i32
    return %c0_i32, %c0_i32_0 : i32, i32
  }
  func.func @transform_3(%arg0: i32) -> (i32, i32) {
    %c0_i32 = arith.constant 0 : i32
    %c0_i32_0 = arith.constant 0 : i32
    return %arg0, %c0_i32 : i32, i32
  }
}

</mosaic_0001>

<bundles_post_ra>
// kernel: tpu_custom_call.1
= control target key start
LH: loop header
LB: loop body
LE: loop exit
PB: predicated region body
PF: predicated region fallthrough
CT: control target
= control target key end

     0   :  { %8 = vsyncpa [#allocation3], 0  ;;  %s323_s0 = inlined_call_operand.hbm [shape: f32[4,128], index: 0, kind: input, shape index: {}]   ;;  %s324_s1 = inlined_call_operand.vmem [shape: f32[1,128], index: 1, kind: input, shape index: {}]   ;;  %s325_s2 = inlined_call_operand.vmem [shape: f32[1,128], index: 2, kind: input, shape index: {}]   ;;  %s326_s3 = inlined_call_operand.hbm [shape: f32[4,128], index: 3, kind: output, shape index: {}]  }
   0x1   :  { %9 = vsyncpa [#allocation4], 0  ;;  %s240_s12 = smov [#allocation2]   ;;  %s192_s16 = scalar_lea.hbm %s323_s0, 64 }
   0x2   :  { %s16_s13 = sshll.u32 %s240_s12, 4  ;;  %p193_p0 = scmp.ne.s32.totalorder %s323_s0, %s192_s16  ;;  %s17_s13 = int_to_ptr.vmem [resolvable:$true] %s16_s13 }
   0x3   :  { %p196_p1 = scmp.lt.u32.totalorder %s192_s16, %s323_s0 }
   0x5   :  { %p198_p2 = pnand %p196_p1, %p193_p0 }
   0x7   :  { %201 = shalt.err (!%p198_p2)
}
   0x8   :  { %s202_s21 = scalar_lea.vmem %s17_s13, 64  ;;  %p207_p4 = scmp.lt.s32.totalorder %s17_s13, %s17_s13 }
   0x9   :  { %p203_p3 = scmp.ne.s32.totalorder %s17_s13, %s202_s21  ;;  %p208_p5 = scmp.lt.s32.totalorder %s202_s21, %s202_s21 }
   0xb   :  { %p209_p6 = por %p208_p5, %p207_p4 }
   0xd   :  { %p210_p7 = pnand %p209_p6, %p203_p3 }
   0xf   :  { %213 = shalt.err (!%p210_p7)
}
  0x10   :  { %19 = dma.hbm_to_vmem [thread:$0]  %s323_s0, 64, %s17_s13, [#allocation3]  }
  0x11   :  { %236 = dma.done.wait [#allocation3], 64  }
  0x12   :  { %237 = vsyncadd [#allocation3], 4294967232  ;;  %v27_v0 = vld [vmem:[#allocation2] sm:$0xf]  ;;  %s241_s24 = smov 96   ;;  %s242_s25 = smov 32  }
  0x13   :  { %52 = vrot.lane.b32.xlu0 %v27_v0, %s241_s24  ;;  %106 = vrot.lane.b32.xlu1 %v27_v0, %s242_s25  ;;  %s243_s26 = smov 64   ;;  %vm30_vm0 = vcmask 257024   ;;  %vm133_vm9 = vcmask 261120   ;;  %vm135_vm10 = vcmask 523264   ;;  %vm137_vm11 = vcmask 785408   ;;  %s244_s30 = smov [#allocation5]  }
  0x14   :  { %v31_v3 = vsel %vm30_vm0, %v27_v0, 0.0  ;;  %s160_s4 = sshll.u32 %s244_s30, 4  ;;  %s161_s4 = int_to_ptr.vmem [resolvable:$true] %s160_s4 }
  0x15   :  { %s214_s5 = scalar_lea.vmem %s161_s4, 64  ;;  %p219_p9 = scmp.lt.s32.totalorder %s161_s4, %s161_s4 }
  0x16   :  { %p215_p8 = scmp.ne.s32.totalorder %s161_s4, %s214_s5  ;;  %p220_p10 = scmp.lt.s32.totalorder %s214_s5, %s214_s5 }
  0x17   :  { %79 = vrot.lane.b32.xlu0 %v27_v0, %s243_s26 }
  0x18   :  { %p221_p11 = por %p220_p10, %p219_p9 }
  0x1a   :  { %p222_p12 = pnand %p221_p11, %p215_p8 }
  0x85   :  { %v53_v1 = vpop.permute.xlu0 %52  ;;  %v107_v5 = vpop.permute.xlu1 %106 }
  0x86   :  { %v55_v2 = vsel %vm30_vm0, %v53_v1, 0.0  ;;  %v109_v7 = vsel %vm30_vm0, %v107_v5, 0.0 }
  0x87   :  { %56 = vadd.xlane.f32.xlu1 %v55_v2 }
  0x89   :  { %v80_v4 = vpop.permute.xlu0 %79 }
  0x8a   :  { %v82_v6 = vsel %vm30_vm0, %v80_v4, 0.0 }
  0x8b   :  { %83 = vadd.xlane.f32.xlu0 %v82_v6  ;;  %32 = vadd.xlane.f32.xlu1 %v31_v3  ;;  %v169_v6 = vld [vmem:[%s324_s1] ss:$0 sm:$0xff] }
  0x8f   :  { %110 = vadd.xlane.f32.xlu0 %v109_v7 }
 0x114   :  { %v57_v8 = vpop.xlane.xlu1 %56 }
 0x115   :  { %v58_v9 = vmul.f32 0.03125, %v57_v8 }
 0x117   :  { %v281_v10 = vsub.f32 %v27_v0, %v58_v9 }
 0x118   :  { %v84_v11 = vpop.xlane.xlu0 %83  ;;  %v33_v20 = vpop.xlane.xlu1 %32 }
 0x119   :  { %v85_v12 = vmul.f32 0.03125, %v84_v11  ;;  %v60_v13 = vmul.f32 %v281_v10, %v281_v10  ;;  %v34_v21 = vmul.f32 0.03125, %v33_v20 }
 0x11b   :  { %v285_v14 = vsub.f32 %v27_v0, %v85_v12  ;;  %62 = vrot.lane.b32.xlu0 %v60_v13, %s241_s24  ;;  %v293_v22 = vsub.f32 %v27_v0, %v34_v21 }
 0x11c   :  { %v111_v15 = vpop.xlane.xlu0 %110 }
 0x11d   :  { %v112_v16 = vmul.f32 0.03125, %v111_v15  ;;  %v87_v17 = vmul.f32 %v285_v14, %v285_v14  ;;  %v36_v23 = vmul.f32 %v293_v22, %v293_v22 }
 0x11f   :  { %v289_v18 = vsub.f32 %v27_v0, %v112_v16  ;;  %89 = vrot.lane.b32.xlu1 %v87_v17, %s243_s26  ;;  %v37_v24 = vsel %vm30_vm0, %v36_v23, 0.0 }
 0x121   :  { %v114_v19 = vmul.f32 %v289_v18, %v289_v18 }
 0x123   :  { %116 = vrot.lane.b32.xlu1 %v114_v19, %s242_s25 }
 0x13a   :  { %38 = vadd.xlane.f32.xlu0 %v37_v24 }
 0x18d   :  { %v63_v25 = vpop.permute.xlu0 %62 }
 0x18e   :  { %v65_v26 = vsel %vm30_vm0, %v63_v25, 0.0 }
 0x18f   :  { %66 = vadd.xlane.f32.xlu1 %v65_v26 }
 0x191   :  { %v90_v27 = vpop.permute.xlu1 %89 }
 0x192   :  { %v92_v28 = vsel %vm30_vm0, %v90_v27, 0.0 }
 0x193   :  { %93 = vadd.xlane.f32.xlu0 %v92_v28 }
 0x195   :  { %v117_v29 = vpop.permute.xlu1 %116 }
 0x196   :  { %v119_v30 = vsel %vm30_vm0, %v117_v29, 0.0 }
 0x197   :  { %120 = vadd.xlane.f32.xlu0 %v119_v30 }
 0x1c7   :  { %v39_v31 = vpop.xlane.xlu0 %38 }
 0x1c8   :  { %v40_v32 = vmul.f32 0.032258064, %v39_v31 }
 0x1ca   :  { %176 = vrsqrt.f32 %v40_v32  ;;  %vm43_vm1 = vcmp.eq.f32.partialorder %v40_v32, inf  ;;  %v46_v41 = vand.u32 2147483648, %v40_v32  ;;  %vm45_vm2 = vcmp.eq.f32.partialorder %v40_v32, 0.0 }
 0x1d4   :  { %v177_v37 = vpop.eup %176 }
 0x1d5   :  { %v42_v39 = vmul.f32 %v177_v37, %v40_v32 }
 0x1d7   :  { %v44_v43 = vsel %vm43_vm1, %v40_v32, %v42_v39 }
 0x1d8   :  { %v47_v46 = vsel %vm45_vm2, %v46_v41, %v44_v43 }
 0x1d9   :  { %v48_v52 = vadd.f32 1e-06, %v47_v46 }
 0x21c   :  { %v67_v33 = vpop.xlane.xlu1 %66 }
 0x21d   :  { %v68_v34 = vmul.f32 0.032258064, %v67_v33 }
 0x21f   :  { %178 = vrsqrt.f32 %v68_v34  ;;  %vm71_vm3 = vcmp.eq.f32.partialorder %v68_v34, inf  ;;  %v74_v45 = vand.u32 2147483648, %v68_v34  ;;  %vm73_vm4 = vcmp.eq.f32.partialorder %v68_v34, 0.0 }
 0x220   :  { %v94_v35 = vpop.xlane.xlu0 %93 }
 0x221   :  { %v95_v36 = vmul.f32 0.032258064, %v94_v35 }
 0x223   :  { %180 = vrsqrt.f32 %v95_v36  ;;  %vm98_vm5 = vcmp.eq.f32.partialorder %v95_v36, inf  ;;  %v101_v53 = vand.u32 2147483648, %v95_v36  ;;  %vm100_vm6 = vcmp.eq.f32.partialorder %v95_v36, 0.0 }
 0x224   :  { %v121_v38 = vpop.xlane.xlu0 %120 }
 0x225   :  { %v122_v40 = vmul.f32 0.032258064, %v121_v38 }
 0x227   :  { %182 = vrsqrt.f32 %v122_v40  ;;  %vm125_vm7 = vcmp.eq.f32.partialorder %v122_v40, inf  ;;  %v128_v59 = vand.u32 2147483648, %v122_v40  ;;  %vm127_vm8 = vcmp.eq.f32.partialorder %v122_v40, 0.0 }
 0x229   :  { %v179_v42 = vpop.eup %178 }
 0x22a   :  { %v70_v44 = vmul.f32 %v179_v42, %v68_v34 }
 0x22c   :  { %v72_v47 = vsel %vm71_vm3, %v68_v34, %v70_v44 }
 0x22d   :  { %v181_v48 = vpop.eup %180  ;;  %v75_v49 = vsel %vm73_vm4, %v74_v45, %v72_v47 }
 0x22e   :  { %v76_v50 = vadd.f32 1e-06, %v75_v49  ;;  %v97_v51 = vmul.f32 %v181_v48, %v95_v36 }
 0x230   :  { %v99_v54 = vsel %vm98_vm5, %v95_v36, %v97_v51  ;;  %184 = vrcp.f32 %v76_v50 }
 0x231   :  { %v183_v55 = vpop.eup %182  ;;  %v102_v56 = vsel %vm100_vm6, %v101_v53, %v99_v54  ;;  %186 = vrcp.f32 %v48_v52 }
 0x232   :  { %v103_v57 = vadd.f32 1e-06, %v102_v56  ;;  %v124_v58 = vmul.f32 %v183_v55, %v122_v40 }
 0x234   :  { %188 = vrcp.f32 %v103_v57  ;;  %v126_v60 = vsel %vm125_vm7, %v122_v40, %v124_v58 }
 0x235   :  { %v129_v61 = vsel %vm127_vm8, %v128_v59, %v126_v60 }
 0x236   :  { %v130_v62 = vadd.f32 1e-06, %v129_v61 }
 0x238   :  { %190 = vrcp.f32 %v130_v62 }
 0x23a   :  { %v185_v63 = vpop.eup %184 }
 0x23b   :  { %v187_v0 = vpop.eup %186  ;;  %v78_v2 = vmul.f32 %v185_v63, %v281_v10  ;;  %v170_v10 = vld [vmem:[%s325_s2] ss:$0 sm:$0xff] }
 0x23c   :  { %v50_v4 = vmul.f32 %v187_v0, %v293_v22 }
 0x23e   :  { %v189_v1 = vpop.eup %188  ;;  %v134_v8 = vsel %vm133_vm9, %v50_v4, %v78_v2 }
 0x23f   :  { %v105_v3 = vmul.f32 %v189_v1, %v285_v14 }
 0x241   :  { %v136_v9 = vsel %vm135_vm10, %v134_v8, %v105_v3 }
 0x242   :  { %v191_v5 = vpop.eup %190 }
 0x243   :  { %v132_v7 = vmul.f32 %v191_v5, %v289_v18 }
 0x245   :  { %v138_v11 = vsel %vm137_vm11, %v136_v9, %v132_v7 }
 0x246   :  { %v145_v12 = vmul.f32 %v169_v6, %v138_v11 }
 0x248   :  { %v152_v13 = vadd.f32 %v170_v10, %v145_v12 }
 0x24a   :  { %153 = vst [vmem:[#allocation5] sm:$0xf] %v152_v13 }
 0x24b   :  { %225 = shalt.err (!%p222_p12)
}
 0x24c   :  { %s226_s7 = scalar_lea.hbm %s326_s3, 64 }
 0x24d   :  { %p227_p13 = scmp.ne.s32.totalorder %s326_s3, %s226_s7  ;;  %p230_p0 = scmp.lt.u32.totalorder %s226_s7, %s326_s3 }
 0x24f   :  { %p232_p1 = pnand %p230_p0, %p227_p13 }
 0x251   :  { %235 = shalt.err (!%p232_p1)
}
 0x252   :  { %163 = dma.vmem_to_hbm [thread:$0]  %s161_s4, 64, %s326_s3, [#allocation4]  }
 0x253   :  { %238 = dma.done.wait [#allocation4], 64  }
 0x254   :  { %239 = vsyncadd [#allocation4], 4294967232 }
 0x255   :  { %167 = vsyncpa [#allocation3], 1 }
 0x256   :  { %168 = vsyncpa [#allocation4], 1 }

</bundles_post_ra>
